<compile_context>
chip_gen: v7x
topology: tpu7x:2x2x1
jax: 0.10.0
libtpu: 0.0.40
codegen_flags: <defaults>
</compile_context>

<pallas_src>
import jax
import jax.numpy as jnp
from jax.experimental import pallas as pl
from jax.experimental.pallas import tpu as pltpu


def _round_up(n, m):
    return ((n + m - 1) // m) * m


def _cdiv(a, b):
    return -(-a // b)


def dqn_kernel(x_ref, w1_ref, b1_ref, w2_ref, b2_ref, w3_ref, b3_ref, out_ref):
    # x tile: (TB, S) bf16; weights bf16; biases f32. Three MXU matmuls with
    # f32 accumulation; bias add + ReLU ride in VPU slots under MXU slack.
    x = x_ref[...]
    h1 = jnp.dot(x, w1_ref[...], preferred_element_type=jnp.float32) + b1_ref[...]
    h1 = jnp.maximum(h1, 0.0).astype(jnp.bfloat16)
    h2 = jnp.dot(h1, w2_ref[...], preferred_element_type=jnp.float32) + b2_ref[...]
    h2 = jnp.maximum(h2, 0.0).astype(jnp.bfloat16)
    out = jnp.dot(h2, w3_ref[...], preferred_element_type=jnp.float32) + b3_ref[...]
    out_ref[...] = out.astype(out_ref.dtype)  # bf16 writeback (lane-dense)


def prepare_params(params):
    """One-time cast/pad of the f32 params (hoisted out of the per-call path).

    Returns (bf16/padded params tuple, action_size).
    """
    w1, b1, w2, b2, w3, b3 = params
    A = w3.shape[1]
    A_pad = _round_up(max(A, 128), 128)   # lane-dense output columns

    w1b = w1.astype(jnp.bfloat16)
    w2b = w2.astype(jnp.bfloat16)
    w3b = jnp.pad(w3, ((0, 0), (0, A_pad - A))).astype(jnp.bfloat16)
    b1f = b1.reshape(1, -1).astype(jnp.float32)
    b2f = b2.reshape(1, -1).astype(jnp.float32)
    b3f = jnp.pad(b3.reshape(1, -1), ((0, 0), (0, A_pad - A))).astype(jnp.float32)
    return (w1b, b1f, w2b, b2f, w3b, b3f), A


def _choose_batch_tile(B, block_batch):
    TILE = 16  # bf16 sublane packing
    num_tiles = max(_cdiv(B, block_batch), 1)
    # v7x megacore: make sure >=2 tiles exist when the batch is big enough so
    # both TensorCores get work (no-op cost on single-TC v5e/v6e).
    if num_tiles == 1 and B > TILE:
        num_tiles = 2
    TB = _round_up(_cdiv(B, num_tiles), TILE)
    B_pad = _round_up(B, TB)
    return TB, B_pad


def dqn_forward(x, prepared_params, action_size, *, block_batch=1024):
    """x: (B, state_size) float32. prepared_params: output of prepare_params."""
    w1b, b1f, w2b, b2f, w3b, b3f = prepared_params
    B, S = x.shape
    H = w1b.shape[1]
    A = action_size
    A_pad = w3b.shape[1]

    TB, B_pad = _choose_batch_tile(B, block_batch)
    grid = (B_pad // TB,)

    # Zero-padded batch rows are computed but sliced away; padded W3 columns /
    # b3 entries are zero so padded output columns are exactly 0.
    xp = jnp.pad(x, ((0, B_pad - B), (0, 0))).astype(jnp.bfloat16)

    flops = 2 * B_pad * (S * H + H * H + H * A_pad)
    bytes_accessed = (
        B_pad * S * 2                               # x (bf16)
        + (S * H + H * H + H * A_pad) * 2           # weights (bf16)
        + (H + H + A_pad) * 4                       # biases (f32)
        + B_pad * A_pad * 2                         # out (bf16)
    )

    out = pl.pallas_call(
        dqn_kernel,
        out_shape=jax.ShapeDtypeStruct((B_pad, A_pad), jnp.bfloat16),
        grid=grid,
        in_specs=[
            pl.BlockSpec((TB, S), lambda i: (i, 0)),        # x: tiled over batch
            pl.BlockSpec((S, H), lambda i: (0, 0)),         # w1: VMEM-resident
            pl.BlockSpec((1, H), lambda i: (0, 0)),         # b1
            pl.BlockSpec((H, H), lambda i: (0, 0)),         # w2
            pl.BlockSpec((1, H), lambda i: (0, 0)),         # b2
            pl.BlockSpec((H, A_pad), lambda i: (0, 0)),     # w3 (lane-padded)
            pl.BlockSpec((1, A_pad), lambda i: (0, 0)),     # b3 (lane-padded)
        ],
        out_specs=pl.BlockSpec((TB, A_pad), lambda i: (i, 0)),
        compiler_params=pltpu.CompilerParams(
            dimension_semantics=("parallel",),              # megacore on v7x
            vmem_limit_bytes=32 * 1024 * 1024,              # safe on v5e/v6e/v7x
        ),
        cost_estimate=pl.CostEstimate(
            flops=flops, transcendentals=0, bytes_accessed=bytes_accessed
        ),
    )(xp, w1b, b1f, w2b, b2f, w3b, b3f)

    return out[:B, :A].astype(jnp.float32)


def init_params(key, state_size, action_size, hidden=128):
    # Mimics PyTorch nn.Linear default init: U(-1/sqrt(fan_in), 1/sqrt(fan_in)).
    def linear(key, fan_in, fan_out):
        kw, kb = jax.random.split(key)
        bound = 1.0 / jnp.sqrt(float(fan_in))
        w = jax.random.uniform(kw, (fan_in, fan_out), jnp.float32, -bound, bound)
        b = jax.random.uniform(kb, (1, fan_out), jnp.float32, -bound, bound)
        return w, b

    k1, k2, k3 = jax.random.split(key, 3)
    w1, b1 = linear(k1, state_size, hidden)
    w2, b2 = linear(k2, hidden, hidden)
    w3, b3 = linear(k3, hidden, action_size)
    return (w1, b1, w2, b2, w3, b3)


def _reference(x, params):
    # Plain-JAX reference replicating the kernel's mixed precision exactly
    # (bf16 operands, f32 accumulation, f32 bias/ReLU, bf16 output rounding).
    w1, b1, w2, b2, w3, b3 = params
    xb = x.astype(jnp.bfloat16)
    h1 = jnp.dot(xb, w1.astype(jnp.bfloat16),
                 preferred_element_type=jnp.float32) + b1
    h1 = jnp.maximum(h1, 0.0).astype(jnp.bfloat16)
    h2 = jnp.dot(h1, w2.astype(jnp.bfloat16),
                 preferred_element_type=jnp.float32) + b2
    h2 = jnp.maximum(h2, 0.0).astype(jnp.bfloat16)
    out = jnp.dot(h2, w3.astype(jnp.bfloat16),
                  preferred_element_type=jnp.float32) + b3
    return out.astype(jnp.bfloat16).astype(jnp.float32)


if __name__ == "__main__":
    key = jax.random.PRNGKey(0)
    kx, kp = jax.random.split(key)

    batch, state_size, action_size = 2, 8, 4
    x = jax.random.normal(kx, (batch, state_size), jnp.float32)
    params = init_params(kp, state_size, action_size)

    # Hoisted once per param update, not per forward call.
    prepared, A = prepare_params(params)

    fwd = jax.jit(lambda xv: dqn_forward(xv, prepared, A))
    out = fwd(x)
    jax.block_until_ready(out)

    ref = _reference(x, params)
    assert out.shape == (batch, action_size)
    err = float(jnp.max(jnp.abs(out - ref)))
    scale = 1.0 + float(jnp.max(jnp.abs(ref)))
    assert err <= 2e-2 * scale, f"max abs diff {err} (scale {scale})"

    print("KERNEL_OK")
</pallas_src>

<mosaic_0001>
module attributes {stable_mosaic.version = 11 : i64} {
  func.func @dqn_kernel(%arg0: i32, %arg1: memref<16x8xbf16, #tpu.memory_space<vmem>>, %arg2: memref<8x128xbf16, #tpu.memory_space<vmem>>, %arg3: memref<1x128xf32, #tpu.memory_space<vmem>>, %arg4: memref<128x128xbf16, #tpu.memory_space<vmem>>, %arg5: memref<1x128xf32, #tpu.memory_space<vmem>>, %arg6: memref<128x128xbf16, #tpu.memory_space<vmem>>, %arg7: memref<1x128xf32, #tpu.memory_space<vmem>>, %arg8: memref<16x128xbf16, #tpu.memory_space<vmem>>) attributes {dimension_semantics = [#tpu.dimension_semantics<parallel>], iteration_bounds = array<i64: 1>, scalar_prefetch = 0 : i64, scratch_operands = 0 : i64, tpu.core_type = #tpu.core_type<tc>, window_params = [{transform_indices = @transform_0, window_bounds = array<i64: 16, 8>}, {pipeline_mode = #tpu.pipeline_mode<synchronous>, transform_indices = @transform_1, window_bounds = array<i64: 8, 128>}, {pipeline_mode = #tpu.pipeline_mode<synchronous>, transform_indices = @transform_2, window_bounds = array<i64: 1, 128>}, {pipeline_mode = #tpu.pipeline_mode<synchronous>, transform_indices = @transform_3, window_bounds = array<i64: 128, 128>}, {pipeline_mode = #tpu.pipeline_mode<synchronous>, transform_indices = @transform_4, window_bounds = array<i64: 1, 128>}, {pipeline_mode = #tpu.pipeline_mode<synchronous>, transform_indices = @transform_5, window_bounds = array<i64: 128, 128>}, {pipeline_mode = #tpu.pipeline_mode<synchronous>, transform_indices = @transform_6, window_bounds = array<i64: 1, 128>}, {transform_indices = @transform_7, window_bounds = array<i64: 16, 128>}]} {
    %c0 = arith.constant 0 : index
    %c0_0 = arith.constant 0 : index
    %0 = vector.load %arg1[%c0, %c0_0] : memref<16x8xbf16, #tpu.memory_space<vmem>>, vector<16x8xbf16>
    %c0_1 = arith.constant 0 : index
    %c0_2 = arith.constant 0 : index
    %1 = vector.load %arg2[%c0_1, %c0_2] : memref<8x128xbf16, #tpu.memory_space<vmem>>, vector<8x128xbf16>
    %cst = arith.constant dense<0.000000e+00> : vector<16x128xf32>
    %2 = tpu.matmul %0, %1, %cst {dimension_numbers = #tpu.dot_dimension_numbers<[1], [0], [0], [1], [0, 0, 1, 1], [], []>} : vector<16x8xbf16>, vector<8x128xbf16>, vector<16x128xf32> -> vector<16x128xf32>
    %c0_3 = arith.constant 0 : index
    %c0_4 = arith.constant 0 : index
    %3 = vector.load %arg3[%c0_3, %c0_4] : memref<1x128xf32, #tpu.memory_space<vmem>>, vector<1x128xf32>
    %4 = vector.broadcast %3 : vector<1x128xf32> to vector<16x128xf32>
    %5 = arith.addf %2, %4 : vector<16x128xf32>
    %cst_5 = arith.constant 0.000000e+00 : f32
    %6 = vector.broadcast %cst_5 : f32 to vector<16x128xf32>
    %7 = arith.maximumf %5, %6 : vector<16x128xf32>
    %8 = arith.truncf %7 : vector<16x128xf32> to vector<16x128xbf16>
    %c0_6 = arith.constant 0 : index
    %c0_7 = arith.constant 0 : index
    %9 = vector.load %arg4[%c0_6, %c0_7] : memref<128x128xbf16, #tpu.memory_space<vmem>>, vector<128x128xbf16>
    %cst_8 = arith.constant dense<0.000000e+00> : vector<16x128xf32>
    %10 = tpu.matmul %8, %9, %cst_8 {dimension_numbers = #tpu.dot_dimension_numbers<[1], [0], [0], [1], [0, 0, 1, 1], [], []>} : vector<16x128xbf16>, vector<128x128xbf16>, vector<16x128xf32> -> vector<16x128xf32>
    %c0_9 = arith.constant 0 : index
    %c0_10 = arith.constant 0 : index
    %11 = vector.load %arg5[%c0_9, %c0_10] : memref<1x128xf32, #tpu.memory_space<vmem>>, vector<1x128xf32>
    %12 = vector.broadcast %11 : vector<1x128xf32> to vector<16x128xf32>
    %13 = arith.addf %10, %12 : vector<16x128xf32>
    %cst_11 = arith.constant 0.000000e+00 : f32
    %14 = vector.broadcast %cst_11 : f32 to vector<16x128xf32>
    %15 = arith.maximumf %13, %14 : vector<16x128xf32>
    %16 = arith.truncf %15 : vector<16x128xf32> to vector<16x128xbf16>
    %c0_12 = arith.constant 0 : index
    %c0_13 = arith.constant 0 : index
    %17 = vector.load %arg6[%c0_12, %c0_13] : memref<128x128xbf16, #tpu.memory_space<vmem>>, vector<128x128xbf16>
    %cst_14 = arith.constant dense<0.000000e+00> : vector<16x128xf32>
    %18 = tpu.matmul %16, %17, %cst_14 {dimension_numbers = #tpu.dot_dimension_numbers<[1], [0], [0], [1], [0, 0, 1, 1], [], []>} : vector<16x128xbf16>, vector<128x128xbf16>, vector<16x128xf32> -> vector<16x128xf32>
    %c0_15 = arith.constant 0 : index
    %c0_16 = arith.constant 0 : index
    %19 = vector.load %arg7[%c0_15, %c0_16] : memref<1x128xf32, #tpu.memory_space<vmem>>, vector<1x128xf32>
    %20 = vector.broadcast %19 : vector<1x128xf32> to vector<16x128xf32>
    %21 = arith.addf %18, %20 : vector<16x128xf32>
    %22 = arith.truncf %21 : vector<16x128xf32> to vector<16x128xbf16>
    %c0_17 = arith.constant 0 : index
    %c0_18 = arith.constant 0 : index
    %23 = vector.load %arg8[%c0_17, %c0_18] : memref<16x128xbf16, #tpu.memory_space<vmem>>, vector<16x128xbf16>
    tpu.vector_store %arg8[%c0_17, %c0_18], %22 {strides = array<i32>} : memref<16x128xbf16, #tpu.memory_space<vmem>>, vector<16x128xbf16>,
    return
  }
  func.func @transform_0(%arg0: i32) -> (i32, i32) {
    %c0_i32 = arith.constant 0 : i32
    %c0_i32_0 = arith.constant 0 : i32
    return %arg0, %c0_i32 : i32, i32
  }
  func.func @transform_1(%arg0: i32) -> (i32, i32) {
    %c0_i32 = arith.constant 0 : i32
    %c0_i32_0 = arith.constant 0 : i32
    %c0_i32_1 = arith.constant 0 : i32
    return %c0_i32, %c0_i32_0 : i32, i32
  }
  func.func @transform_2(%arg0: i32) -> (i32, i32) {
    %c0_i32 = arith.constant 0 : i32
    %c0_i32_0 = arith.constant 0 : i32
    %c0_i32_1 = arith.constant 0 : i32
    return %c0_i32, %c0_i32_0 : i32, i32
  }
  func.func @transform_3(%arg0: i32) -> (i32, i32) {
    %c0_i32 = arith.constant 0 : i32
    %c0_i32_0 = arith.constant 0 : i32
    %c0_i32_1 = arith.constant 0 : i32
    return %c0_i32, %c0_i32_0 : i32, i32
  }
  func.func @transform_4(%arg0: i32) -> (i32, i32) {
    %c0_i32 = arith.constant 0 : i32
    %c0_i32_0 = arith.constant 0 : i32
    %c0_i32_1 = arith.constant 0 : i32
    return %c0_i32, %c0_i32_0 : i32, i32
  }
  func.func @transform_5(%arg0: i32) -> (i32, i32) {
    %c0_i32 = arith.constant 0 : i32
    %c0_i32_0 = arith.constant 0 : i32
    %c0_i32_1 = arith.constant 0 : i32
    return %c0_i32, %c0_i32_0 : i32, i32
  }
  func.func @transform_6(%arg0: i32) -> (i32, i32) {
    %c0_i32 = arith.constant 0 : i32
    %c0_i32_0 = arith.constant 0 : i32
    %c0_i32_1 = arith.constant 0 : i32
    return %c0_i32, %c0_i32_0 : i32, i32
  }
  func.func @transform_7(%arg0: i32) -> (i32, i32) {
    %c0_i32 = arith.constant 0 : i32
    %c0_i32_0 = arith.constant 0 : i32
    return %arg0, %c0_i32 : i32, i32
  }
}

</mosaic_0001>

<bundles_post_ra>
// kernel: _lambda_.1
= control target key start
LH: loop header
LB: loop body
LE: loop exit
PB: predicated region body
PF: predicated region fallthrough
CT: control target
= control target key end

     0   :  { %12 = vsyncpa [#allocation3], 0  ;;  %s643_s0 = inlined_call_operand.vmem [shape: bf16[16,8], index: 0, kind: input, shape index: {}]   ;;  %s644_s1 = inlined_call_operand.vmem [shape: bf16[8,128], index: 1, kind: input, shape index: {}]   ;;  %s645_s2 = inlined_call_operand.vmem [shape: f32[1,128], index: 2, kind: input, shape index: {}]   ;;  %s646_s3 = inlined_call_operand.hbm [shape: bf16[128,128], index: 3, kind: input, shape index: {}]   ;;  %s647_s4 = inlined_call_operand.vmem [shape: f32[1,128], index: 4, kind: input, shape index: {}]   ;;  %s648_s5 = inlined_call_operand.hbm [shape: bf16[128,128], index: 5, kind: input, shape index: {}]   ;;  %s649_s6 = inlined_call_operand.vmem [shape: f32[1,128], index: 6, kind: input, shape index: {}]   ;;  %s650_s7 = inlined_call_operand.vmem [shape: bf16[16,128], index: 7, kind: output, shape index: {}]  }
   0x1   :  { %13 = vsyncpa [#allocation5], 0  ;;  %s532_s24 = smov [#allocation2]   ;;  %s484_s28 = scalar_lea.hbm %s646_s3, 1024 }
   0x2   :  { %s25_s25 = sshll.u32 %s532_s24, 4  ;;  %p485_p0 = scmp.ne.s32.totalorder %s646_s3, %s484_s28  ;;  %s26_s25 = int_to_ptr.vmem [resolvable:$true] %s25_s25 }
   0x3   :  { %p488_p1 = scmp.lt.u32.totalorder %s484_s28, %s646_s3 }
   0x5   :  { %p490_p2 = pnand %p488_p1, %p485_p0 }
   0x7   :  { %493 = shalt.err (!%p490_p2)
}
   0x8   :  { %s494_s10 = scalar_lea.vmem %s26_s25, 1024  ;;  %p499_p4 = scmp.lt.s32.totalorder %s26_s25, %s26_s25 }
   0x9   :  { %p495_p3 = scmp.ne.s32.totalorder %s26_s25, %s494_s10  ;;  %p500_p5 = scmp.lt.s32.totalorder %s494_s10, %s494_s10 }
   0xb   :  { %p501_p6 = por %p500_p5, %p499_p4 }
   0xd   :  { %p502_p7 = pnand %p501_p6, %p495_p3 }
   0xf   :  { %505 = shalt.err (!%p502_p7)
}
  0x10   :  { %s533_s11 = smov 64   ;;  %s534_s12 = smov 4  }
  0x11   :  { %31 = dma.hbm_to_vmem [thread:$0]  %s646_s3, 1024, %s26_s25, [#allocation3], %s533_s11, %s533_s11, %s534_s12  }
  0x12   :  { %s535_s15 = smov [#allocation4]   ;;  %s506_s19 = scalar_lea.hbm %s648_s5, 1024 }
  0x13   :  { %s39_s16 = sshll.u32 %s535_s15, 4  ;;  %p507_p8 = scmp.ne.s32.totalorder %s648_s5, %s506_s19  ;;  %s40_s16 = int_to_ptr.vmem [resolvable:$true] %s39_s16 }
  0x14   :  { %p510_p9 = scmp.lt.u32.totalorder %s506_s19, %s648_s5 }
  0x16   :  { %p512_p10 = pnand %p510_p9, %p507_p8 }
  0x18   :  { %515 = shalt.err (!%p512_p10)
}
  0x19   :  { %s516_s24 = scalar_lea.vmem %s40_s16, 1024  ;;  %p521_p12 = scmp.lt.s32.totalorder %s40_s16, %s40_s16 }
  0x1a   :  { %p517_p11 = scmp.ne.s32.totalorder %s40_s16, %s516_s24  ;;  %p522_p13 = scmp.lt.s32.totalorder %s516_s24, %s516_s24 }
  0x1c   :  { %p523_p0 = por %p522_p13, %p521_p12 }
  0x1e   :  { %p524_p1 = pnand %p523_p0, %p517_p11 }
  0x20   :  { %527 = shalt.err (!%p524_p1)
}
  0x21   :  { %45 = dma.hbm_to_vmem [thread:$0]  %s648_s5, 1024, %s40_s16, [#allocation5], %s533_s11, %s533_s11, %s534_s12  }
  0x22   :  { %528 = dma.done.wait [#allocation3], 1024  }
  0x23   :  { %529 = vsyncadd [#allocation3], 4294966272 }
  0x24   :  { %530 = dma.done.wait [#allocation5], 1024  }
  0x25   :  { %531 = vsyncadd [#allocation5], 4294966272  ;;  %v536_v0 = vmov 0.0   ;;  %vm537_vm0 = vmmov 0   ;;  %vm74_vm1 = vcmask 1043456   ;;  %v467_v3 = vld [vmem:[%s643_s0] sm:$0xff]  }
  0x26   :  { %415 = vmatprep.subr.bf16.mxu0 %v536_v0  ;;  %417 = vmatprep.mubr.msk.bf16.mxu0 %vm537_vm0, %v536_v0  ;;  %v57_v1 = vld [vmem:[%s644_s1] sm:$0xf]  ;;  %vm70_vm2 = vcmask 64512   ;;  %v469_v5 = vld [vmem:[#allocation2 + $0x8] sm:$0xff]   ;;  %v470_v6 = vld [vmem:[#allocation2 + $0x10] sm:$0xff]  }
  0x27   :  { %421 = vmatprep.subr.bf16.mxu1 %v536_v0  ;;  %437 = vmatprep.mubr.msk.bf16.mxu1 %vm537_vm0, %v536_v0  ;;  %v76_v2 = vsel %vm74_vm1, %v57_v1, 0  ;;  %v468_v4 = vld [vmem:[#allocation2] sm:$0xff]   ;;  %v471_v7 = vld [vmem:[#allocation2 + $0x18] sm:$0xff]   ;;  %v473_v9 = vld [vmem:[#allocation2 + $0x28] sm:$0xff]  }
  0x28   :  { %416 = vmatpush3.bf16.msra.mxu0 %v76_v2  ;;  %422 = vmatpush3.bf16.msra.mxu1 %v468_v4  ;;  %v472_v8 = vld [vmem:[#allocation2 + $0x20] sm:$0xff]   ;;  %v474_v10 = vld [vmem:[#allocation2 + $0x30] sm:$0xff]   ;;  %v475_v11 = vld [vmem:[#allocation2 + $0x38] sm:$0xff]  }
  0x29   :  { %441 = vmatprep.subr.bf16.mxu0 %v536_v0  ;;  %423 = vmatprep.subr.bf16.mxu1 %v536_v0  ;;  %v476_v12 = vld [vmem:[#allocation4] sm:$0xff]   ;;  %v477_v13 = vld [vmem:[#allocation4 + $0x8] sm:$0xff]   ;;  %v478_v14 = vld [vmem:[#allocation4 + $0x10] sm:$0xff]  }
  0x2a   :  { %v479_v15 = vld [vmem:[#allocation4 + $0x18] sm:$0xff]   ;;  %v480_v16 = vld [vmem:[#allocation4 + $0x20] sm:$0xff]   ;;  %v481_v17 = vld [vmem:[#allocation4 + $0x28] sm:$0xff]  }
  0x2b   :  { %418 = vmatmul.mubr.msk.bf16.vlgmr.msra.gmra.mrb[0].mxu0 %vm70_vm2, %v467_v3  ;;  %v365_v18 = vld [vmem:[%s645_s2] ss:$0 sm:$0xff]  ;;  %v482_v28 = vld [vmem:[#allocation4 + $0x30] sm:$0xff]   ;;  %v483_v29 = vld [vmem:[#allocation4 + $0x38] sm:$0xff]  }
  0x2c   :  { %457 = vmatprep.mubr.msk.bf16.mxu0 %vm537_vm0, %v536_v0  ;;  %424 = vmatpush3.bf16.msra.mxu1 %v469_v5  ;;  %v368_v30 = vld [vmem:[%s647_s4] ss:$0 sm:$0xff] }
  0x2d   :  { %425 = vmatprep.subr.bf16.mxu1 %v536_v0  ;;  %442 = vmatpush3.bf16.msra.mxu0 %v476_v12  ;;  %v377_v40 = vld [vmem:[%s649_s6] ss:$0 sm:$0xff] }
  0x2e   :  { %443 = vmatprep.subr.bf16.mxu0 %v536_v0 }
  0x30   :  { %426 = vmatpush3.bf16.msra.mxu1 %v470_v6 }
  0x31   :  { %427 = vmatprep.subr.bf16.mxu1 %v536_v0  ;;  %444 = vmatpush3.bf16.msra.mxu0 %v477_v13 }
  0x32   :  { %445 = vmatprep.subr.bf16.mxu0 %v536_v0 }
  0x34   :  { %428 = vmatpush3.bf16.msra.mxu1 %v471_v7 }
  0x35   :  { %429 = vmatprep.subr.bf16.mxu1 %v536_v0  ;;  %446 = vmatpush3.bf16.msra.mxu0 %v478_v14 }
  0x36   :  { %447 = vmatprep.subr.bf16.mxu0 %v536_v0 }
  0x38   :  { %430 = vmatpush3.bf16.msra.mxu1 %v472_v8 }
  0x39   :  { %431 = vmatprep.subr.bf16.mxu1 %v536_v0  ;;  %448 = vmatpush3.bf16.msra.mxu0 %v479_v15 }
  0x3a   :  { %449 = vmatprep.subr.bf16.mxu0 %v536_v0 }
  0x3c   :  { %432 = vmatpush3.bf16.msra.mxu1 %v473_v9 }
  0x3d   :  { %433 = vmatprep.subr.bf16.mxu1 %v536_v0  ;;  %450 = vmatpush3.bf16.msra.mxu0 %v480_v16 }
  0x3e   :  { %451 = vmatprep.subr.bf16.mxu0 %v536_v0 }
  0x40   :  { %434 = vmatpush3.bf16.msra.mxu1 %v474_v10 }
  0x41   :  { %435 = vmatprep.subr.bf16.mxu1 %v536_v0  ;;  %452 = vmatpush3.bf16.msra.mxu0 %v481_v17 }
  0x42   :  { %453 = vmatprep.subr.bf16.mxu0 %v536_v0 }
  0x44   :  { %436 = vmatpush3.bf16.msra.mxu1 %v475_v11 }
  0x45   :  { %454 = vmatpush3.bf16.msra.mxu0 %v482_v28 }
  0x46   :  { %455 = vmatprep.subr.bf16.mxu0 %v536_v0 }
  0x49   :  { %456 = vmatpush3.bf16.msra.mxu0 %v483_v29 }
  0xfe   :  { %v112_v19 = vpop.f32.mrb[0].mxu0 }
  0xff   :  { %v113_v20 = vadd.f32 %v365_v18, %v112_v19  ;;  %v419_v21 = vpop.f32.mrb[1].mxu0 }
 0x100   :  { %v115_v22 = vpop.f32.mrb[2].mxu0 }
 0x101   :  { %v116_v23 = vadd.f32 %v365_v18, %v115_v22  ;;  %v420_v24 = vpop.f32.mrb[3].mxu0  ;;  %v119_v25 = vmax.f32 %v113_v20, 0.0 }
 0x103   :  { %v120_v26 = vmax.f32 %v116_v23, 0.0 }
 0x105   :  { %v121_v27 = vpack.c.bf16 %v120_v26, %v119_v25 }
 0x107   :  { %438 = vmatmul.mubr.bf16.vlgmr.msra.gmra.mrb[0].mxu1 %v121_v27 }
 0x1da   :  { %v227_v31 = vpop.f32.mrb[0].mxu1 }
 0x1db   :  { %v228_v32 = vadd.f32 %v368_v30, %v227_v31  ;;  %v439_v33 = vpop.f32.mrb[1].mxu1 }
 0x1dc   :  { %v230_v34 = vpop.f32.mrb[2].mxu1 }
 0x1dd   :  { %v231_v35 = vadd.f32 %v368_v30, %v230_v34  ;;  %v440_v36 = vpop.f32.mrb[3].mxu1  ;;  %v234_v37 = vmax.f32 %v228_v32, 0.0 }
 0x1df   :  { %v235_v38 = vmax.f32 %v231_v35, 0.0 }
 0x1e1   :  { %v236_v39 = vpack.c.bf16 %v235_v38, %v234_v37 }
 0x1e3   :  { %458 = vmatmul.mubr.bf16.vlgmr.msra.gmra.mrb[4].mxu0 %v236_v39 }
 0x2b6   :  { %v342_v41 = vpop.f32.mrb[4].mxu0 }
 0x2b7   :  { %v459_v42 = vpop.f32.mrb[5].mxu0  ;;  %v343_v44 = vadd.f32 %v377_v40, %v342_v41 }
 0x2b8   :  { %v345_v43 = vpop.f32.mrb[6].mxu0 }
 0x2b9   :  { %v346_v45 = vadd.f32 %v377_v40, %v345_v43  ;;  %v460_v46 = vpop.f32.mrb[7].mxu0 }
 0x2bb   :  { %v393_v47 = vpack.c.bf16 %v346_v45, %v343_v44 }
 0x2bd   :  { %394 = vst [vmem:[%s650_s7] sm:$0xff] %v393_v47  }
 0x2be   :  { %363 = vsyncpa [#allocation3], 1 }
 0x2bf   :  { %364 = vsyncpa [#allocation5], 1 }

</bundles_post_ra>
